<compile_context>
chip_gen: v5e
topology: v5e:2x2
jax: 0.10.0
libtpu: 0.0.40
codegen_flags: <defaults>
</compile_context>

<pallas_src>
import jax
import jax.numpy as jnp
from jax.experimental import pallas as pl
from jax.experimental.pallas import tpu as pltpu


def _round_up(a, m):
    return ((a + m - 1) // m) * m


def _linear_sigmoid_kernel(w_ref, b_ref, xt_ref, ot_ref):
    # w_ref : (6,) f32 SMEM, row-major [w00,w01,w02, w10,w11,w12]
    # b_ref : (2,) f32 SMEM
    # xt_ref: (3, TB) f32 VMEM  (features on sublanes, batch on lanes)
    # ot_ref: (2, TB) f32 VMEM
    x0 = xt_ref[0:1, :]                 # (1, TB)
    x1 = xt_ref[1:2, :]
    x2 = xt_ref[2:3, :]
    # Two output rows as broadcast FMAs on the VPU (scalars broadcast from
    # SMEM); exp lands on the EUP; exact divide keeps the 1e-5 tolerance.
    y0 = x0 * w_ref[0] + x1 * w_ref[1] + x2 * w_ref[2] + b_ref[0]
    y1 = x0 * w_ref[3] + x1 * w_ref[4] + x2 * w_ref[5] + b_ref[1]
    ot_ref[0:1, :] = 1.0 / (1.0 + jnp.exp(-y0))
    ot_ref[1:2, :] = 1.0 / (1.0 + jnp.exp(-y1))


def stage_two_model(x, weight, bias, *, target_steps=8, max_tile_b=131072):
    """x: (B, 3) f32, weight: (2, 3) f32, bias: (2,) f32 -> (B, 2) f32."""
    B, K = x.shape
    N, K2 = weight.shape
    assert K == 3 and K2 == 3 and N == 2, "StageTwoModel expects Linear(3, 2)"

    lane = 128
    # Tile size derived from a small target step count, always a multiple of
    # 128, capped so the double-buffered VMEM footprint stays ~5 MiB.
    tb = _round_up(max(-(-B // target_steps), 1), lane)
    tb = min(tb, _round_up(max_tile_b, lane))
    n_steps = -(-B // tb)
    b_pad = n_steps * tb                # padding bounded by tb-1 (< 128*steps rows)

    # Wrapper-side layout plumbing: single pad of the transposed input
    # (padded lanes just compute sigmoid(bias) and are sliced away; benign).
    xt = jnp.pad(x.astype(jnp.float32).T, ((0, 0), (0, b_pad - B)))
    w_flat = weight.astype(jnp.float32).reshape(-1)    # (6,)
    b_flat = bias.astype(jnp.float32).reshape(-1)      # (2,)

    out_t = pl.pallas_call(
        _linear_sigmoid_kernel,
        out_shape=jax.ShapeDtypeStruct((N, b_pad), jnp.float32),
        grid=(n_steps,),
        in_specs=[
            pl.BlockSpec(memory_space=pltpu.MemorySpace.SMEM),   # weights (scalars)
            pl.BlockSpec(memory_space=pltpu.MemorySpace.SMEM),   # bias    (scalars)
            pl.BlockSpec((K, tb), lambda i: (0, i)),             # x tile, lane-dense
        ],
        out_specs=pl.BlockSpec((N, tb), lambda i: (0, i)),       # out tile, lane-dense
        compiler_params=pltpu.CompilerParams(
            dimension_semantics=("parallel",)),
        cost_estimate=pl.CostEstimate(
            flops=10 * b_pad,
            transcendentals=2 * b_pad,
            bytes_accessed=(3 + 2) * 4 * b_pad),
    )(w_flat, b_flat, xt)

    # Back to the module's (B, 2) contract.
    return out_t[:, :B].T


def _init_params(key):
    # Deterministic init mimicking torch.nn.Linear(3, 2) default
    # (uniform in +/- 1/sqrt(fan_in)).
    kw, kb = jax.random.split(key)
    bound = 1.0 / jnp.sqrt(3.0)
    weight = jax.random.uniform(kw, (2, 3), jnp.float32, -bound, bound)
    bias = jax.random.uniform(kb, (2,), jnp.float32, -bound, bound)
    return weight, bias


if __name__ == "__main__":
    key = jax.random.PRNGKey(0)
    k_x, k_p, k_x2 = jax.random.split(key, 3)

    weight, bias = _init_params(k_p)

    # Small-shape run (single 128-lane tile, 1-step grid).
    B = 8
    x = jax.random.normal(k_x, (B, 3), dtype=jnp.float32)
    out = jax.block_until_ready(stage_two_model(x, weight, bias))
    ref = jax.nn.sigmoid(x @ weight.T + bias)
    assert out.shape == (B, 2)
    assert jnp.allclose(out, ref, atol=1e-5), "mismatch vs reference (B=8)"

    # Larger batch exercises the multi-step 'parallel' grid + padding path
    # (B=1000 -> tb=128, 8 grid steps, 24 padded columns).
    B2 = 1000
    x2 = jax.random.normal(k_x2, (B2, 3), dtype=jnp.float32)
    out2 = jax.block_until_ready(stage_two_model(x2, weight, bias))
    ref2 = jax.nn.sigmoid(x2 @ weight.T + bias)
    assert out2.shape == (B2, 2)
    assert jnp.allclose(out2, ref2, atol=1e-5), "mismatch vs reference (B=1000)"

    print("KERNEL_OK")
</pallas_src>

<mosaic_0001>
module attributes {stable_mosaic.version = 11 : i64} {
  func.func @_linear_sigmoid_kernel(%arg0: i32, %arg1: memref<6xf32, #tpu.memory_space<smem>>, %arg2: memref<2xf32, #tpu.memory_space<smem>>, %arg3: memref<3x128xf32, #tpu.memory_space<vmem>>, %arg4: memref<2x128xf32, #tpu.memory_space<vmem>>) attributes {dimension_semantics = [#tpu.dimension_semantics<parallel>], iteration_bounds = array<i64: 1>, scalar_prefetch = 0 : i64, scratch_operands = 0 : i64, tpu.core_type = #tpu.core_type<tc>, window_params = [{transform_indices = @transform_0, window_bounds = array<i64: 6>}, {transform_indices = @transform_1, window_bounds = array<i64: 2>}, {transform_indices = @transform_2, window_bounds = array<i64: 3, 128>}, {transform_indices = @transform_3, window_bounds = array<i64: 2, 128>}]} {
    %c0 = arith.constant 0 : index
    %c0_0 = arith.constant 0 : index
    %0 = vector.load %arg3[%c0, %c0_0] : memref<3x128xf32, #tpu.memory_space<vmem>>, vector<1x128xf32>
    %c1 = arith.constant 1 : index
    %c0_1 = arith.constant 0 : index
    %1 = vector.load %arg3[%c1, %c0_1] : memref<3x128xf32, #tpu.memory_space<vmem>>, vector<1x128xf32>
    %c2 = arith.constant 2 : index
    %c0_2 = arith.constant 0 : index
    %2 = vector.load %arg3[%c2, %c0_2] : memref<3x128xf32, #tpu.memory_space<vmem>>, vector<1x128xf32>
    %c0_3 = arith.constant 0 : index
    %3 = memref.load %arg1[%c0_3] : memref<6xf32, #tpu.memory_space<smem>>
    %4 = vector.broadcast %3 : f32 to vector<1x128xf32>
    %5 = arith.mulf %0, %4 : vector<1x128xf32>
    %c1_4 = arith.constant 1 : index
    %6 = memref.load %arg1[%c1_4] : memref<6xf32, #tpu.memory_space<smem>>
    %7 = vector.broadcast %6 : f32 to vector<1x128xf32>
    %8 = arith.mulf %1, %7 : vector<1x128xf32>
    %9 = arith.addf %5, %8 : vector<1x128xf32>
    %c2_5 = arith.constant 2 : index
    %10 = memref.load %arg1[%c2_5] : memref<6xf32, #tpu.memory_space<smem>>
    %11 = vector.broadcast %10 : f32 to vector<1x128xf32>
    %12 = arith.mulf %2, %11 : vector<1x128xf32>
    %13 = arith.addf %9, %12 : vector<1x128xf32>
    %c0_6 = arith.constant 0 : index
    %14 = memref.load %arg2[%c0_6] : memref<2xf32, #tpu.memory_space<smem>>
    %15 = vector.broadcast %14 : f32 to vector<1x128xf32>
    %16 = arith.addf %13, %15 : vector<1x128xf32>
    %c3 = arith.constant 3 : index
    %17 = memref.load %arg1[%c3] : memref<6xf32, #tpu.memory_space<smem>>
    %18 = vector.broadcast %17 : f32 to vector<1x128xf32>
    %19 = arith.mulf %0, %18 : vector<1x128xf32>
    %c4 = arith.constant 4 : index
    %20 = memref.load %arg1[%c4] : memref<6xf32, #tpu.memory_space<smem>>
    %21 = vector.broadcast %20 : f32 to vector<1x128xf32>
    %22 = arith.mulf %1, %21 : vector<1x128xf32>
    %23 = arith.addf %19, %22 : vector<1x128xf32>
    %c5 = arith.constant 5 : index
    %24 = memref.load %arg1[%c5] : memref<6xf32, #tpu.memory_space<smem>>
    %25 = vector.broadcast %24 : f32 to vector<1x128xf32>
    %26 = arith.mulf %2, %25 : vector<1x128xf32>
    %27 = arith.addf %23, %26 : vector<1x128xf32>
    %c1_7 = arith.constant 1 : index
    %28 = memref.load %arg2[%c1_7] : memref<2xf32, #tpu.memory_space<smem>>
    %29 = vector.broadcast %28 : f32 to vector<1x128xf32>
    %30 = arith.addf %27, %29 : vector<1x128xf32>
    %cst = arith.constant 0.000000e+00 : f32
    %31 = vector.broadcast %cst : f32 to vector<1x128xf32>
    %32 = arith.subf %31, %16 : vector<1x128xf32>
    %33 = math.exp %32 : vector<1x128xf32>
    %cst_8 = arith.constant 1.000000e+00 : f32
    %34 = vector.broadcast %cst_8 : f32 to vector<1x128xf32>
    %35 = arith.addf %34, %33 : vector<1x128xf32>
    %cst_9 = arith.constant 1.000000e+00 : f32
    %36 = vector.broadcast %cst_9 : f32 to vector<1x128xf32>
    %37 = arith.divf %36, %35 : vector<1x128xf32>
    %c0_10 = arith.constant 0 : index
    %c0_11 = arith.constant 0 : index
    %38 = vector.load %arg4[%c0_10, %c0_11] : memref<2x128xf32, #tpu.memory_space<vmem>>, vector<1x128xf32>
    tpu.vector_store %arg4[%c0_10, %c0_11], %37 {strides = array<i32>} : memref<2x128xf32, #tpu.memory_space<vmem>>, vector<1x128xf32>,
    %cst_12 = arith.constant 0.000000e+00 : f32
    %39 = vector.broadcast %cst_12 : f32 to vector<1x128xf32>
    %40 = arith.subf %39, %30 : vector<1x128xf32>
    %41 = math.exp %40 : vector<1x128xf32>
    %cst_13 = arith.constant 1.000000e+00 : f32
    %42 = vector.broadcast %cst_13 : f32 to vector<1x128xf32>
    %43 = arith.addf %42, %41 : vector<1x128xf32>
    %cst_14 = arith.constant 1.000000e+00 : f32
    %44 = vector.broadcast %cst_14 : f32 to vector<1x128xf32>
    %45 = arith.divf %44, %43 : vector<1x128xf32>
    %c1_15 = arith.constant 1 : index
    %c0_16 = arith.constant 0 : index
    %46 = vector.load %arg4[%c1_15, %c0_16] : memref<2x128xf32, #tpu.memory_space<vmem>>, vector<1x128xf32>
    tpu.vector_store %arg4[%c1_15, %c0_16], %45 {strides = array<i32>} : memref<2x128xf32, #tpu.memory_space<vmem>>, vector<1x128xf32>,
    return
  }
  func.func @transform_0(%arg0: i32) -> i32 {
    %c0_i32 = arith.constant 0 : i32
    %c0_i32_0 = arith.constant 0 : i32
    return %c0_i32 : i32
  }
  func.func @transform_1(%arg0: i32) -> i32 {
    %c0_i32 = arith.constant 0 : i32
    %c0_i32_0 = arith.constant 0 : i32
    return %c0_i32 : i32
  }
  func.func @transform_2(%arg0: i32) -> (i32, i32) {
    %c0_i32 = arith.constant 0 : i32
    %c0_i32_0 = arith.constant 0 : i32
    return %c0_i32, %arg0 : i32, i32
  }
  func.func @transform_3(%arg0: i32) -> (i32, i32) {
    %c0_i32 = arith.constant 0 : i32
    %c0_i32_0 = arith.constant 0 : i32
    return %c0_i32, %arg0 : i32, i32
  }
}

</mosaic_0001>

<bundles_post_ra>
// kernel: tpu_custom_call.1
= control target key start
LH: loop header
LB: loop body
LE: loop exit
PB: predicated region body
PF: predicated region fallthrough
CT: control target
= control target key end

     0   :  { %8 = vsyncpa [#allocation5], 0  ;;  %s278_s0 = inlined_call_operand.hbm [shape: f32[6], index: 0, kind: input, shape index: {}]   ;;  %s279_s1 = inlined_call_operand.hbm [shape: f32[2], index: 1, kind: input, shape index: {}]   ;;  %s280_s2 = inlined_call_operand.hbm [shape: f32[3,128], index: 2, kind: input, shape index: {}]   ;;  %s281_s3 = inlined_call_operand.hbm [shape: f32[2,128], index: 3, kind: output, shape index: {}]  }
   0x1   :  { %9 = vsyncpa [#allocation7], 0 }
   0x2   :  { %10 = vsyncpa [#allocation3], 0 }
   0x3   :  { %11 = vsyncpa [#allocation4], 0  ;;  %s17_s14 = sshll.u32 %s278_s0, 4  ;;  %s26_s17 = sshll.u32 %s279_s1, 4  ;;  %s18_s14 = int_to_ptr.hbm [resolvable:$true] %s17_s14  ;;  %s27_s17 = int_to_ptr.hbm [resolvable:$true] %s26_s17 }
   0x4   :  { %s242_s18 = smov [#allocation2]   ;;  %s243_s19 = smov [#allocation6]  }
   0x5   :  { %20 = dma.hbm_to_smem %s18_s14, 16, %s242_s18, [#allocation5]  }
   0x6   :  { %29 = dma.hbm_to_smem %s27_s17, 16, %s243_s19, [#allocation7]  }
   0x7   :  { %s35_s22 = sshll.u32 %s280_s2, 4  ;;  %s244_s23 = smov [#allocation8]   ;;  %s36_s22 = int_to_ptr.hbm [resolvable:$true] %s35_s22 }
   0x8   :  { %s37_s24 = sshll.u32 %s244_s23, 4  ;;  %s38_s24 = int_to_ptr.vmem [resolvable:$true] %s37_s24 }
   0x9   :  { %40 = dma.hbm_to_vmem [thread:$0]  %s36_s22, 64, %s38_s24, [#allocation3]  }
   0xa   :  { %234 = dma.done.wait [#allocation5], 16  }
   0xb   :  { %235 = vsyncadd [#allocation5], 4294967280 }
   0xc   :  { %236 = dma.done.wait [#allocation7], 16  }
   0xd   :  { %237 = vsyncadd [#allocation7], 4294967280 }
   0xe   :  { %238 = dma.done.wait [#allocation3], 64  }
   0xf   :  { %239 = vsyncadd [#allocation3], 4294967232 }
  0x10   :  { %53 = sfence }
  0x11   :  { %s57_s0 = sld [smem:[#allocation2]]  ;;  %v54_v0 = vld [vmem:[#allocation8] sm:$0x1]  ;;  %v55_v1 = vld [vmem:[#allocation8 + $0x1] sm:$0x1]  ;;  %s245_s30 = smov [#allocation9]  }
  0x12   :  { %s144_s1 = sld [smem:[#allocation2 + $0x1]]  ;;  %v56_v2 = vld [vmem:[#allocation8 + $0x2] sm:$0x1]  ;;  %s130_s4 = sshll.u32 %s245_s30, 4  ;;  %s131_s4 = int_to_ptr.vmem [resolvable:$true] %s130_s4 }
  0x13   :  { %s145_s25 = sld [smem:[#allocation2 + $0x2]]  ;;  %s132_s7 = sshll.u32 %s281_s3, 4  ;;  %s133_s7 = int_to_ptr.hbm [resolvable:$true] %s132_s7 }
  0x14   :  { %s68_s26 = sld [smem:[#allocation6]] }
  0x15   :  { %s146_s27 = sld [smem:[#allocation2 + $0x3]] }
  0x16   :  { %s147_s2 = sld [smem:[#allocation2 + $0x4]] }
  0x17   :  { %v58_v3 = vstv %s57_s0  ;;  %s148_s28 = sld [smem:[#allocation2 + $0x5]] }
  0x18   :  { %v59_v4 = vmul.f32 %v58_v3, %v54_v0  ;;  %v61_v5 = vstv %s144_s1  ;;  %s149_s29 = sld [smem:[#allocation6 + $0x1]] }
  0x19   :  { %v62_v6 = vmul.f32 %v61_v5, %v55_v1  ;;  %v65_v7 = vstv %s145_s25 }
  0x1a   :  { %v66_v8 = vmul.f32 %v65_v7, %v56_v2  ;;  %v69_v11 = vstv %s68_s26 }
  0x1b   :  { %v63_v9 = vadd.f32 %v62_v6, %v59_v4  ;;  %v72_v10 = vstv %s146_s27 }
  0x1c   :  { %v73_v12 = vmul.f32 %v72_v10, %v54_v0  ;;  %v75_v13 = vstv %s147_s2 }
  0x1d   :  { %v67_v14 = vadd.f32 %v66_v8, %v63_v9  ;;  %v76_v15 = vmul.f32 %v75_v13, %v55_v1  ;;  %v79_v16 = vstv %s148_s28 }
  0x1e   :  { %v80_v17 = vmul.f32 %v79_v16, %v56_v2  ;;  %v83_v20 = vstv %s149_s29 }
  0x1f   :  { %v70_v18 = vadd.f32 %v69_v11, %v67_v14  ;;  %v77_v19 = vadd.f32 %v76_v15, %v73_v12 }
  0x21   :  { %v85_v21 = vsub.f32 0.0, %v70_v18  ;;  %v81_v22 = vadd.f32 %v80_v17, %v77_v19 }
  0x23   :  { %v86_v23 = vmul.f32 1.442695, %v85_v21  ;;  %v84_v24 = vadd.f32 %v83_v20, %v81_v22 }
  0x25   :  { %154 = vpow2.f32 %v86_v23  ;;  %v105_v25 = vsub.f32 0.0, %v84_v24 }
  0x27   :  { %v106_v26 = vmul.f32 1.442695, %v105_v25 }
  0x29   :  { %156 = vpow2.f32 %v106_v26 }
  0x2b   :  { %v155_v27 = vpop.eup %154 }
  0x2c   :  { %v88_v28 = vadd.f32 1.0, %v155_v27 }
  0x2e   :  { %158 = vrcp.f32 %v88_v28  ;;  %v98_v33 = vand.u32 2147483647, %v88_v28  ;;  %v100_v34 = vand.u32 2147483648, %v88_v28  ;;  %vm94_vm0 = vweird.f32 %v88_v28 }
  0x2f   :  { %v157_v29 = vpop.eup %156 }
  0x30   :  { %v108_v30 = vadd.f32 1.0, %v157_v29  ;;  %vm99_vm3 = vcmp.eq.f32.partialorder %v98_v33, 8.507059e+37  ;;  %v101_v39 = vor.u32 1.1754944e-38, %v100_v34 }
  0x32   :  { %160 = vrcp.f32 %v108_v30  ;;  %vm114_vm4 = vweird.f32 %v108_v30  ;;  %v120_v40 = vand.u32 2147483648, %v108_v30  ;;  %v118_v43 = vand.u32 2147483647, %v108_v30 }
  0x34   :  { %v159_v31 = vpop.eup %158  ;;  %v121_v47 = vor.u32 1.1754944e-38, %v120_v40  ;;  %vm119_vm7 = vcmp.eq.f32.partialorder %v118_v43, 8.507059e+37 }
  0x35   :  { %v90_v32 = vmul.f32 %v159_v31, %v88_v28  ;;  %vm95_vm1 = vweird.f32 %v159_v31 }
  0x36   :  { %vm96_vm2 = vmor %vm94_vm0, %vm95_vm1 }
  0x37   :  { %v91_v35 = vsub.f32 1.0, %v90_v32 }
  0x38   :  { %v161_v36 = vpop.eup %160 }
  0x39   :  { %v92_v37 = vmul.f32 %v159_v31, %v91_v35  ;;  %v110_v38 = vmul.f32 %v161_v36, %v108_v30  ;;  %vm115_vm5 = vweird.f32 %v161_v36 }
  0x3a   :  { %vm116_vm6 = vmor %vm114_vm4, %vm115_vm5 }
  0x3b   :  { %v93_v41 = vadd.f32 %v159_v31, %v92_v37  ;;  %v111_v42 = vsub.f32 1.0, %v110_v38 }
  0x3d   :  { %v97_v44 = vsel %vm96_vm2, %v159_v31, %v93_v41  ;;  %v112_v45 = vmul.f32 %v161_v36, %v111_v42 }
  0x3e   :  { %v102_v46 = vsel %vm99_vm3, %v101_v39, %v97_v44 }
  0x3f   :  { %104 = vst [vmem:[#allocation9] sm:$0x1] %v102_v46  ;;  %v113_v48 = vadd.f32 %v161_v36, %v112_v45 }
  0x41   :  { %v117_v49 = vsel %vm116_vm6, %v161_v36, %v113_v48 }
  0x42   :  { %v122_v50 = vsel %vm119_vm7, %v121_v47, %v117_v49 }
  0x43   :  { %124 = vst [vmem:[#allocation9 + $0x1] sm:$0x1] %v122_v50 }
  0x44   :  { %135 = dma.vmem_to_hbm [thread:$0]  %s131_s4, 32, %s133_s7, [#allocation4]  }
  0x45   :  { %240 = dma.done.wait [#allocation4], 32  }
  0x46   :  { %241 = vsyncadd [#allocation4], 4294967264 }
  0x47   :  { %140 = vsyncpa [#allocation3], 1 }
  0x48   :  { %141 = vsyncpa [#allocation4], 1 }
  0x49   :  { %142 = vsyncpa [#allocation5], 1 }
  0x4a   :  { %143 = vsyncpa [#allocation7], 1 }

</bundles_post_ra>
